<compile_context>
chip_gen: v7x
topology: tpu7x:2x2x1
jax: 0.10.0
libtpu: 0.0.40
codegen_flags: <defaults>
</compile_context>

<pallas_src>
import functools
import math

import jax
import jax.numpy as jnp
from jax.experimental import pallas as pl
from jax.experimental.pallas import tpu as pltpu


# --------------------------------------------------------------------------- #
# Helpers
# --------------------------------------------------------------------------- #
def _round_up(x, m):
    return ((x + m - 1) // m) * m


def _cdiv(a, b):
    return (a + b - 1) // b


def _pad2(a, rows, cols):
    pr, pc = rows - a.shape[0], cols - a.shape[1]
    return a if (pr == 0 and pc == 0) else jnp.pad(a, ((0, pr), (0, pc)))


def _pad1(a, n):
    p = n - a.shape[0]
    return a if p == 0 else jnp.pad(a, (0, p))


def _gelu(h, approximate):
    if approximate:
        # tanh approximation -> routes to EUP, cheaper on the VALU slot.
        return jax.nn.gelu(h, approximate=True)
    # Exact GELU (nn.GELU default): 0.5 * x * (1 + erf(x / sqrt(2))).
    return 0.5 * h * (1.0 + jax.lax.erf(h * (1.0 / math.sqrt(2.0))))


def _vmem_physical_bytes():
    try:
        return int(pltpu.get_tpu_info().vmem_capacity_bytes)
    except Exception:
        pass
    try:
        kind = jax.devices()[0].device_kind.lower()
        if ("v4" in kind) or ("v5" in kind) or ("v6" in kind):
            return 128 << 20
    except Exception:
        pass
    return 64 << 20  # conservative: v7x per-TensorCore VMEM


def _hw_caps():
    """Returns (physical VMEM, request budget, default tile_m) per generation."""
    phys = _vmem_physical_bytes()
    if phys >= (128 << 20):
        # v5e/v6e: 128 MiB physical -> allow ~100 MiB requests, big row tiles.
        return phys, 100 << 20, 512
    # v7x: 64 MiB per TC -> never request the whole thing (compiler scratch).
    return phys, 52 << 20, 256


# --------------------------------------------------------------------------- #
# Kernels
# --------------------------------------------------------------------------- #
def _ffn_resident_kernel(x_ref, w1_ref, b1_ref, w2_ref, b2_ref, o_ref, *,
                         approximate):
    # x_ref: (TM, E)  w1_ref: (E, H)  b1_ref: (1, H)  w2_ref: (H, E)
    # b2_ref: (1, E)  o_ref: (TM, E).  Weights fully VMEM-resident.
    x = x_ref[...]
    h = jnp.dot(x, w1_ref[...], preferred_element_type=jnp.float32) + b1_ref[...]
    h = _gelu(h, approximate)
    # Dropout(eval) == identity.
    y = jnp.dot(h.astype(x.dtype), w2_ref[...], preferred_element_type=jnp.float32)
    o_ref[...] = (y + b2_ref[...]).astype(o_ref.dtype)


def _ffn_streamed_kernel(x_ref, w1_ref, b1_ref, w2_ref, b2_ref, o_ref, acc_ref,
                         *, approximate):
    # x_ref: (TM, E)  w1_ref: (1, E, TH)  b1_ref: (1, TH)  w2_ref: (TH, E)
    # b2_ref: (1, E)  o_ref: (TM, E)  acc_ref: (TM, E) f32 scratch persistent
    # across the hidden grid axis.
    h_idx = pl.program_id(1)

    @pl.when(h_idx == 0)
    def _init():
        acc_ref[...] = jnp.zeros_like(acc_ref)

    x = x_ref[...]
    h = jnp.dot(x, w1_ref[0], preferred_element_type=jnp.float32) + b1_ref[...]
    h = _gelu(h, approximate)
    # Dropout(eval) == identity.
    acc_ref[...] += jnp.dot(h.astype(x.dtype), w2_ref[...],
                            preferred_element_type=jnp.float32)

    @pl.when(h_idx == pl.num_programs(1) - 1)
    def _finalize():
        o_ref[...] = (acc_ref[...] + b2_ref[...]).astype(o_ref.dtype)


# --------------------------------------------------------------------------- #
# One-time parameter preparation (keep OUT of the per-call hot path)
# --------------------------------------------------------------------------- #
def prepare_ffn_params(w1, b1, w2, b2, *, tile_h=512, vmem_budget=None):
    """Pads weights once, picks resident vs streamed layout.

    w1: (E, H), b1: (H,), w2: (H, E), b2: (E,)  (pre-transposed vs PyTorch's
    nn.Linear weight layout).
    """
    E, H = w1.shape
    assert w2.shape == (H, E) and b1.shape == (H,) and b2.shape == (E,)
    wbytes = jnp.dtype(w1.dtype).itemsize
    _, hw_budget, _ = _hw_caps()
    budget = hw_budget if vmem_budget is None else int(vmem_budget)

    E_pad = _round_up(E, 128)
    H128 = _round_up(H, 128)

    # Weights-resident fast path if double-buffered full weights <= half budget.
    resident_bytes = 2 * ((2 * E_pad * H128) + H128 + E_pad) * wbytes
    if resident_bytes <= budget // 2:
        H_pad = H128
        return dict(mode="resident", emb_dim=E, hidden=H,
                    e_pad=E_pad, h_pad=H_pad, num_h=1, tile_h=H_pad,
                    budget=budget, wbytes=wbytes,
                    w1=_pad2(w1, E_pad, H_pad),
                    b1=_pad1(b1, H_pad).reshape(1, H_pad),
                    w2=_pad2(w2, H_pad, E_pad),
                    b2=_pad1(b2, E_pad).reshape(1, E_pad))

    # Streamed path: tight H_pad + contiguous-DMA W1 layout (num_h, E, tile_h).
    th = max(128, min(int(tile_h), H128))
    num_h = _cdiv(H128, th)
    tile_h_eff = _round_up(_cdiv(H128, num_h), 128)
    H_pad = num_h * tile_h_eff
    w1p = _pad2(w1, E_pad, H_pad)
    w1p = w1p.reshape(E_pad, num_h, tile_h_eff).transpose(1, 0, 2)
    return dict(mode="streamed", emb_dim=E, hidden=H,
                e_pad=E_pad, h_pad=H_pad, num_h=num_h, tile_h=tile_h_eff,
                budget=budget, wbytes=wbytes,
                w1=w1p,
                b1=_pad1(b1, H_pad).reshape(1, H_pad),
                w2=_pad2(w2, H_pad, E_pad),
                b2=_pad1(b2, E_pad).reshape(1, E_pad))


# --------------------------------------------------------------------------- #
# Forward pass
# --------------------------------------------------------------------------- #
def feed_forward(x, params, *, tile_m=None, approximate_gelu=False):
    """y = gelu(x @ W1 + b1) @ W2 + b2   with x: (B, S, E)."""
    B, S, E = x.shape
    assert E == params["emb_dim"], "emb_dim mismatch"
    M = B * S
    E_pad, H_pad = params["e_pad"], params["h_pad"]
    tile_h, num_h = params["tile_h"], params["num_h"]
    budget, wbytes = params["budget"], params["wbytes"]
    mode = params["mode"]

    _, hw_budget, default_tm = _hw_caps()
    act = jnp.dtype(x.dtype).itemsize
    if tile_m is None:
        tile_m = default_tm

    M8 = _round_up(M, 8)

    # Per-row-tile VMEM footprint (double-buffered x/out + intermediates).
    if mode == "resident":
        weight_vmem = 2 * ((2 * E_pad * H_pad) + H_pad + E_pad) * wbytes
        per_row = 4 * E_pad * act + H_pad * 4 + H_pad * act + E_pad * 4
    else:
        weight_vmem = 2 * ((2 * E_pad * tile_h) + tile_h + E_pad) * wbytes
        per_row = 4 * E_pad * act + tile_h * 4 + tile_h * act + E_pad * 4

    avail = max(0, budget - weight_vmem)
    cap = max(8, (avail // per_row) // 8 * 8)
    tile_m_eff = max(8, min(int(tile_m), cap, M8))
    if tile_m_eff >= 256:
        tile_m_eff = (tile_m_eff // 256) * 256   # fill the 256x256 MXU (v6e/v7x)
    else:
        tile_m_eff = max(8, (tile_m_eff // 8) * 8)
    num_m = _cdiv(M8, tile_m_eff)
    # Keep >= 2 row tiles so the "parallel" axis shards across both v7x TCs
    # (and megacore on v5e/v6e).
    if num_m == 1 and M8 >= 16:
        tile_m_eff = _round_up(_cdiv(M8, 2), 8)
        num_m = _cdiv(M8, tile_m_eff)
    M_pad = num_m * tile_m_eff

    footprint = weight_vmem + tile_m_eff * per_row
    vmem_limit = int(min(hw_budget,
                         max(32 << 20, footprint + (footprint >> 2) + (2 << 20))))

    x2d = x.reshape(M, E)
    if M_pad != M or E_pad != E:
        x2d = jnp.pad(x2d, ((0, M_pad - M), (0, E_pad - E)))

    w1p, b1p, w2p, b2p = params["w1"], params["b1"], params["w2"], params["b2"]

    if mode == "resident":
        kernel = functools.partial(_ffn_resident_kernel,
                                   approximate=approximate_gelu)
        out2d = pl.pallas_call(
            kernel,
            out_shape=jax.ShapeDtypeStruct((M_pad, E_pad), x.dtype),
            grid_spec=pltpu.PrefetchScalarGridSpec(
                num_scalar_prefetch=0,
                grid=(num_m,),
                in_specs=[
                    pl.BlockSpec((tile_m_eff, E_pad), lambda i: (i, 0)),  # x rows
                    pl.BlockSpec((E_pad, H_pad), lambda i: (0, 0)),       # W1
                    pl.BlockSpec((1, H_pad), lambda i: (0, 0)),           # b1
                    pl.BlockSpec((H_pad, E_pad), lambda i: (0, 0)),       # W2
                    pl.BlockSpec((1, E_pad), lambda i: (0, 0)),           # b2
                ],
                out_specs=pl.BlockSpec((tile_m_eff, E_pad), lambda i: (i, 0)),
            ),
            compiler_params=pltpu.CompilerParams(
                dimension_semantics=("parallel",),
                vmem_limit_bytes=vmem_limit,
            ),
        )(x2d, w1p, b1p, w2p, b2p)
    else:
        kernel = functools.partial(_ffn_streamed_kernel,
                                   approximate=approximate_gelu)
        out2d = pl.pallas_call(
            kernel,
            out_shape=jax.ShapeDtypeStruct((M_pad, E_pad), x.dtype),
            grid_spec=pltpu.PrefetchScalarGridSpec(
                num_scalar_prefetch=0,
                grid=(num_m, num_h),
                in_specs=[
                    pl.BlockSpec((tile_m_eff, E_pad), lambda i, h: (i, 0)),  # x
                    pl.BlockSpec((1, E_pad, tile_h), lambda i, h: (h, 0, 0)),  # W1 chunk (contiguous)
                    pl.BlockSpec((1, tile_h), lambda i, h: (0, h)),          # b1 chunk
                    pl.BlockSpec((tile_h, E_pad), lambda i, h: (h, 0)),      # W2 chunk
                    pl.BlockSpec((1, E_pad), lambda i, h: (0, 0)),           # b2
                ],
                out_specs=pl.BlockSpec((tile_m_eff, E_pad), lambda i, h: (i, 0)),
                scratch_shapes=[pltpu.VMEM((tile_m_eff, E_pad), jnp.float32)],
            ),
            compiler_params=pltpu.CompilerParams(
                dimension_semantics=("parallel", "arbitrary"),
                vmem_limit_bytes=vmem_limit,
            ),
        )(x2d, w1p, b1p, w2p, b2p)

    if M_pad != M or E_pad != E:
        out2d = out2d[:M, :E]
    return out2d.reshape(B, S, E)


# --------------------------------------------------------------------------- #
# Init + reference + self-test
# --------------------------------------------------------------------------- #
def init_params(key, emb_dim, dtype=jnp.float32):
    """Mimics nn.Linear init: uniform(-1/sqrt(fan_in), 1/sqrt(fan_in))."""
    hidden = 4 * emb_dim
    k1, k2, k3, k4 = jax.random.split(key, 4)
    bound1 = 1.0 / math.sqrt(emb_dim)
    bound2 = 1.0 / math.sqrt(hidden)
    w1 = jax.random.uniform(k1, (emb_dim, hidden), dtype, -bound1, bound1)
    b1 = jax.random.uniform(k2, (hidden,), dtype, -bound1, bound1)
    w2 = jax.random.uniform(k3, (hidden, emb_dim), dtype, -bound2, bound2)
    b2 = jax.random.uniform(k4, (emb_dim,), dtype, -bound2, bound2)
    return w1, b1, w2, b2


def _reference(x, w1, b1, w2, b2):
    h = x @ w1 + b1
    h = 0.5 * h * (1.0 + jax.lax.erf(h / jnp.sqrt(2.0)))
    return h @ w2 + b2


if __name__ == "__main__":
    # config = {'emb_dim': 32, 'drop_rate': 0.1}; input (batch=2, seq=8, emb=32)
    emb_dim = 32
    batch, seq = 2, 8

    key = jax.random.PRNGKey(0)
    kx, kp = jax.random.split(key)
    x = jax.random.normal(kx, (batch, seq, emb_dim), dtype=jnp.float32)
    w1, b1, w2, b2 = init_params(kp, emb_dim)

    # One-time prep (padding / layout), then the call (weights-resident path).
    params = prepare_ffn_params(w1, b1, w2, b2)
    out = jax.block_until_ready(feed_forward(x, params))

    ref = _reference(x, w1, b1, w2, b2)
    assert out.shape == (batch, seq, emb_dim)
    assert jnp.allclose(out, ref, atol=1e-5, rtol=1e-5), \
        "mismatch vs reference (resident path)"

    # Also exercise the streamed (hidden-axis accumulation) path by forcing a
    # tiny VMEM budget so the fast path is not taken.
    emb_dim2 = 64
    x2 = jax.random.normal(kx, (batch, seq, emb_dim2), dtype=jnp.float32)
    w1b, b1b, w2b, b2b = init_params(kp, emb_dim2)
    params2 = prepare_ffn_params(w1b, b1b, w2b, b2b, tile_h=128,
                                 vmem_budget=512 << 10)
    assert params2["mode"] == "streamed" and params2["num_h"] == 2
    out2 = jax.block_until_ready(feed_forward(x2, params2))
    ref2 = _reference(x2, w1b, b1b, w2b, b2b)
    assert jnp.allclose(out2, ref2, atol=1e-5, rtol=1e-5), \
        "mismatch vs reference (streamed path)"

    print("KERNEL_OK")
</pallas_src>

<mosaic_0001>
module attributes {stable_mosaic.version = 11 : i64} {
  func.func @_ffn_resident_kernel(%arg0: i32, %arg1: memref<8x128xf32, #tpu.memory_space<vmem>>, %arg2: memref<128x128xf32, #tpu.memory_space<vmem>>, %arg3: memref<1x128xf32, #tpu.memory_space<vmem>>, %arg4: memref<128x128xf32, #tpu.memory_space<vmem>>, %arg5: memref<1x128xf32, #tpu.memory_space<vmem>>, %arg6: memref<8x128xf32, #tpu.memory_space<vmem>>) attributes {dimension_semantics = [#tpu.dimension_semantics<parallel>], iteration_bounds = array<i64: 2>, scalar_prefetch = 0 : i64, scratch_operands = 0 : i64, tpu.core_type = #tpu.core_type<tc>, window_params = [{transform_indices = @transform_0, window_bounds = array<i64: 8, 128>}, {pipeline_mode = #tpu.pipeline_mode<synchronous>, transform_indices = @transform_1, window_bounds = array<i64: 128, 128>}, {pipeline_mode = #tpu.pipeline_mode<synchronous>, transform_indices = @transform_2, window_bounds = array<i64: 1, 128>}, {pipeline_mode = #tpu.pipeline_mode<synchronous>, transform_indices = @transform_3, window_bounds = array<i64: 128, 128>}, {pipeline_mode = #tpu.pipeline_mode<synchronous>, transform_indices = @transform_4, window_bounds = array<i64: 1, 128>}, {transform_indices = @transform_5, window_bounds = array<i64: 8, 128>}]} {
    %c0 = arith.constant 0 : index
    %c0_0 = arith.constant 0 : index
    %0 = vector.load %arg1[%c0, %c0_0] : memref<8x128xf32, #tpu.memory_space<vmem>>, vector<8x128xf32>
    %c0_1 = arith.constant 0 : index
    %c0_2 = arith.constant 0 : index
    %1 = vector.load %arg2[%c0_1, %c0_2] : memref<128x128xf32, #tpu.memory_space<vmem>>, vector<128x128xf32>
    %cst = arith.constant dense<0.000000e+00> : vector<8x128xf32>
    %2 = tpu.matmul %0, %1, %cst {dimension_numbers = #tpu.dot_dimension_numbers<[1], [0], [0], [1], [0, 0, 1, 1], [], []>} : vector<8x128xf32>, vector<128x128xf32>, vector<8x128xf32> -> vector<8x128xf32>
    %c0_3 = arith.constant 0 : index
    %c0_4 = arith.constant 0 : index
    %3 = vector.load %arg3[%c0_3, %c0_4] : memref<1x128xf32, #tpu.memory_space<vmem>>, vector<1x128xf32>
    %4 = vector.broadcast %3 : vector<1x128xf32> to vector<8x128xf32>
    %5 = arith.addf %2, %4 : vector<8x128xf32>
    %cst_5 = arith.constant 5.000000e-01 : f32
    %6 = vector.broadcast %cst_5 : f32 to vector<8x128xf32>
    %7 = arith.mulf %6, %5 : vector<8x128xf32>
    %cst_6 = arith.constant 0.707106769 : f32
    %8 = vector.broadcast %cst_6 : f32 to vector<8x128xf32>
    %9 = arith.mulf %5, %8 : vector<8x128xf32>
    %10 = math.erf %9 : vector<8x128xf32>
    %cst_7 = arith.constant 1.000000e+00 : f32
    %11 = vector.broadcast %cst_7 : f32 to vector<8x128xf32>
    %12 = arith.addf %11, %10 : vector<8x128xf32>
    %13 = arith.mulf %7, %12 : vector<8x128xf32>
    %c0_8 = arith.constant 0 : index
    %c0_9 = arith.constant 0 : index
    %14 = vector.load %arg4[%c0_8, %c0_9] : memref<128x128xf32, #tpu.memory_space<vmem>>, vector<128x128xf32>
    %cst_10 = arith.constant dense<0.000000e+00> : vector<8x128xf32>
    %15 = tpu.matmul %13, %14, %cst_10 {dimension_numbers = #tpu.dot_dimension_numbers<[1], [0], [0], [1], [0, 0, 1, 1], [], []>} : vector<8x128xf32>, vector<128x128xf32>, vector<8x128xf32> -> vector<8x128xf32>
    %c0_11 = arith.constant 0 : index
    %c0_12 = arith.constant 0 : index
    %16 = vector.load %arg5[%c0_11, %c0_12] : memref<1x128xf32, #tpu.memory_space<vmem>>, vector<1x128xf32>
    %17 = vector.broadcast %16 : vector<1x128xf32> to vector<8x128xf32>
    %18 = arith.addf %15, %17 : vector<8x128xf32>
    %c0_13 = arith.constant 0 : index
    %c0_14 = arith.constant 0 : index
    %19 = vector.load %arg6[%c0_13, %c0_14] : memref<8x128xf32, #tpu.memory_space<vmem>>, vector<8x128xf32>
    tpu.vector_store %arg6[%c0_13, %c0_14], %18 {strides = array<i32>} : memref<8x128xf32, #tpu.memory_space<vmem>>, vector<8x128xf32>,
    return
  }
  func.func @transform_0(%arg0: i32) -> (i32, i32) {
    %c0_i32 = arith.constant 0 : i32
    %c0_i32_0 = arith.constant 0 : i32
    return %arg0, %c0_i32 : i32, i32
  }
  func.func @transform_1(%arg0: i32) -> (i32, i32) {
    %c0_i32 = arith.constant 0 : i32
    %c0_i32_0 = arith.constant 0 : i32
    %c0_i32_1 = arith.constant 0 : i32
    return %c0_i32, %c0_i32_0 : i32, i32
  }
  func.func @transform_2(%arg0: i32) -> (i32, i32) {
    %c0_i32 = arith.constant 0 : i32
    %c0_i32_0 = arith.constant 0 : i32
    %c0_i32_1 = arith.constant 0 : i32
    return %c0_i32, %c0_i32_0 : i32, i32
  }
  func.func @transform_3(%arg0: i32) -> (i32, i32) {
    %c0_i32 = arith.constant 0 : i32
    %c0_i32_0 = arith.constant 0 : i32
    %c0_i32_1 = arith.constant 0 : i32
    return %c0_i32, %c0_i32_0 : i32, i32
  }
  func.func @transform_4(%arg0: i32) -> (i32, i32) {
    %c0_i32 = arith.constant 0 : i32
    %c0_i32_0 = arith.constant 0 : i32
    %c0_i32_1 = arith.constant 0 : i32
    return %c0_i32, %c0_i32_0 : i32, i32
  }
  func.func @transform_5(%arg0: i32) -> (i32, i32) {
    %c0_i32 = arith.constant 0 : i32
    %c0_i32_0 = arith.constant 0 : i32
    return %arg0, %c0_i32 : i32, i32
  }
}

</mosaic_0001>

<bundles_post_ra>
// kernel: tpu_custom_call.1
= control target key start
LH: loop header
LB: loop body
LE: loop exit
PB: predicated region body
PF: predicated region fallthrough
CT: control target
= control target key end

     0   :  { %10 = vsyncpa [#allocation3], 0  ;;  %s1264_s0 = inlined_call_operand.hbm [shape: f32[16,128], index: 0, kind: input, shape index: {}]   ;;  %s1265_s1 = inlined_call_operand.hbm [shape: f32[128,128], index: 1, kind: input, shape index: {}]   ;;  %s1266_s2 = inlined_call_operand.vmem [shape: f32[1,128], index: 2, kind: input, shape index: {}]   ;;  %s1267_s3 = inlined_call_operand.hbm [shape: f32[128,128], index: 3, kind: input, shape index: {}]   ;;  %s1268_s4 = inlined_call_operand.vmem [shape: f32[1,128], index: 4, kind: input, shape index: {}]   ;;  %s1269_s5 = inlined_call_operand.hbm [shape: f32[16,128], index: 5, kind: output, shape index: {}]  }
   0x1   :  { %12 = vsyncpa [#allocation3 + $0x1], 0 }
   0x2   :  { %13 = vsyncpa [#allocation6], 0 }
   0x3   :  { %14 = vsyncpa [#allocation4], 0 }
   0x4   :  { %16 = vsyncpa [#allocation4 + $0x1], 0  ;;  %s1006_s18 = smov 0   ;;  %s1008_s19 = smov 0  }
   0x5   :  { %s1010_s20 = smov 0   ;;  %s1012_s21 = smov 0  }
   0x6 LB: > { %s1027_s22 = sadd.s32 4294967295, %s965_s21   ;;  %s565_s23 = sadd.s32 4294967294, %s965_s21   ;;  %s965_s21 = sphi %s1012_s21, %s1289_s21   ;;  %s961_s20 = sphi %s1010_s20, %s1288_s20   ;;  %s957_s19 = sphi %s1008_s19, %s1287_s19   ;;  %s953_s18 = sphi %s1006_s18, %s1286_s18  }
   0x7   : > { %p42_p0 = scmp.ne.s32.totalorder %s957_s19, %s953_s18  ;;  %p1270_p1 = scmp.eq.s32.totalorder %s1027_s22, 0 }
   0x8   : > { %p156_p3 = scmp.eq.s32.totalorder %s565_s23, 1  ;;  %p566_p5 = scmp.ge.s32.totalorder %s965_s21, 1 }
   0x9   : > { %p1036_p4 = por %p1270_p1, %p42_p0  ;;  %p163_p7 = scmp.lt.s32.totalorder %s965_s21, 3 }
   0xa   : > { %p1041_p6 = por %p156_p3, %p42_p0  ;;  %s967_s27 = smov [#allocation5]  }
   0xb   : > { %s1273_s24 = scalar_select %p1036_p4, 1, 0 }
   0xc   : > { %s1274_s25 = scalar_select %p1041_p6, 1, 0 }
   0xd   : > { %p1046_p8 = pnand %p566_p5, %p163_p7  ;;  %s175_s28 = sshll.u32 %s967_s27, 4  ;;  %s1050_s28 = int_to_ptr.vmem [resolvable:$true] %s175_s28 }
   0xe   : > { %s968_s30 = smov [#allocation7]   ;;  %s809_s9 = scalar_lea.hbm %s1265_s1, 2048 }
   0xf   : > { %p747_p9 = pneg %p1046_p8  ;;  %s191_s6 = sshll.u32 %s968_s30, 4  ;;  %s1061_s6 = int_to_ptr.vmem [resolvable:$true] %s191_s6 }
  0x10   : > { %p810_p12 = scmp.ne.s32.totalorder %s1265_s1, %s809_s9  ;;  %p816_p5 = scmp.lt.u32.totalorder %s809_s9, %s1265_s1 }
  0x11   : > { %p1057_p11 = pnand %p747_p9, %p1270_p1 }
  0x13   : > { %p811_p13 = pneg %p1057_p11 }
  0x15   : > { %p812_p0 = pnand %p811_p13, %p810_p12 }
  0x17   : > { %p813_p3 = pneg %p812_p0 }
  0x19   : > { %p818_p7 = pnand %p816_p5, %p813_p3 }
  0x1b   : > { %821 = shalt.err (!%p818_p7)
}
  0x1c   : > { %s822_s14 = scalar_lea.vmem %s1050_s28, 2048  ;;  %p830_p2 = scmp.lt.s32.totalorder %s1050_s28, %s1050_s28 }
  0x1d   : > { %p823_p9 = scmp.ne.s32.totalorder %s1050_s28, %s822_s14  ;;  %p831_p12 = scmp.lt.s32.totalorder %s822_s14, %s822_s14 }
  0x1f   : > { %p825_p10 = pnand %p823_p9, %p811_p13  ;;  %p832_p0 = por %p831_p12, %p830_p2 }
  0x21   : > { %p826_p1 = pneg %p825_p10 }
  0x23   : > { %p833_p6 = pnand %p832_p0, %p826_p1 }
  0x25   : > { %836 = shalt.err (!%p833_p6)
}
  0x26   : > { %s969_s15 = smov 128   ;;  %s970_s16 = smov 8  }
  0x27   : > { %750 = dma.hbm_to_vmem [thread:$0]  (!%p1057_p11), %s1265_s1, 2048, %s1050_s28, [#allocation6], %s969_s15, %s969_s15, %s970_s16  }
  0x28   : > { %s837_s7 = scalar_lea.hbm %s1267_s3, 2048 }
  0x29   : > { %p838_p2 = scmp.ne.s32.totalorder %s1267_s3, %s837_s7  ;;  %p844_p10 = scmp.lt.u32.totalorder %s837_s7, %s1267_s3 }
  0x2b   : > { %p840_p1 = pnand %p838_p2, %p811_p13 }
  0x2d   : > { %p841_p6 = pneg %p840_p1 }
  0x2f   : > { %p846_p3 = pnand %p844_p10, %p841_p6 }
  0x31   : > { %849 = shalt.err (!%p846_p3)
}
  0x32   : > { %s850_s28 = scalar_lea.vmem %s1061_s6, 2048  ;;  %p858_p12 = scmp.lt.s32.totalorder %s1061_s6, %s1061_s6 }
  0x33   : > { %p851_p5 = scmp.ne.s32.totalorder %s1061_s6, %s850_s28  ;;  %p859_p0 = scmp.lt.s32.totalorder %s850_s28, %s850_s28 }
  0x35   : > { %p853_p7 = pnand %p851_p5, %p811_p13  ;;  %p860_p2 = por %p859_p0, %p858_p12 }
  0x37   : > { %p854_p9 = pneg %p853_p7 }
  0x39   : > { %p861_p1 = pnand %p860_p2, %p854_p9 }
  0x3b   : > { %864 = shalt.err (!%p861_p1)
}
  0x3c   : > { %753 = dma.hbm_to_vmem [thread:$0]  (!%p1057_p11), %s1267_s3, 2048, %s1061_s6, [#allocation6], %s969_s15, %s969_s15, %s970_s16  }
  0x3d   : > { %s1116_s14 = sadd.s32 1, %s965_s21   ;;  %s29_s29 = sadd.s32 1, %s961_s20 }
  0x3e   : > { %s26_s17 = ssub.s32 %s965_s21, %s1116_s14  ;;  %p36_p13 = scmp.ne.s32.totalorder %s961_s20, %s957_s19 }
  0x3f   : > { %p27_p6 = scmp.eq.s32.totalorder %s26_s17, 0  ;;  %p37_p10 = scmp.eq.s32.totalorder %s965_s21, 0 }
  0x40   : > { %p1277_p3 = scmp.eq.s32.totalorder %s1027_s22, 1  ;;  %p764_p7 = scmp.lt.s32.totalorder %s965_s21, 2 }
  0x41   : > { %s1132_s27 = scalar_select %p27_p6, %s961_s20, %s29_s29  }
  0x42   : > { %p1126_p5 = por %p1277_p3, %p36_p13  ;;  %p38_p9 = por %p37_p10, %p36_p13 }
  0x43   : > { %s208_s30 = sand.u32 1, %s961_s20   ;;  %s571_s6 = sshll.u32 %s965_s21, 7 }
  0x44   : > { %s1278_s23 = scalar_select %p1126_p5, 1, 0 }
  0x45   : > { %s570_s7 = sshll.u32 %s208_s30, 3  ;;  %s1139_s8 = scalar_lea.hbm %s1264_s0, %s571_s6 }
  0x46   : > { %s212_s9 = scalar_lea.vmem [#allocation2], %s570_s7  ;;  %p1143_p11 = pnand %p764_p7, %p38_p9 }
  0x47   : > { %s219_s10 = sshll.u32 %s212_s9, 4  ;;  %s209_s28 = scalar_lea.sflag [#allocation3], %s208_s30  ;;  %s1141_s10 = int_to_ptr.vmem [resolvable:$true] %s219_s10 }
  0x48   : > { %s865_s12 = scalar_lea.hbm %s1139_s8, 128  ;;  %p867_p0 = pneg %p1143_p11 }
  0x49   : > { %p866_p12 = scmp.ne.s32.totalorder %s1139_s8, %s865_s12  ;;  %s870_s17 = scalar_lea.hbm %s1264_s0, 256 }
  0x4a   : > { %p871_p13 = scmp.lt.u32.totalorder %s1139_s8, %s1264_s0  ;;  %p872_p6 = scmp.lt.u32.totalorder %s870_s17, %s865_s12 }
  0x4b   : > { %p868_p2 = pnand %p867_p0, %p866_p12  ;;  %p874_p3 = scmp.lt.u32.totalorder %s865_s12, %s1139_s8 }
  0x4c   : > { %p873_p10 = por %p872_p6, %p871_p13 }
  0x4d   : > { %p869_p1 = pneg %p868_p2 }
  0x4e   : > { %p875_p7 = por %p874_p3, %p873_p10 }
  0x50   : > { %p876_p9 = pnand %p875_p7, %p869_p1 }
  0x52   : > { %879 = shalt.err (!%p876_p9)
}
  0x53   : > { %s880_s30 = scalar_lea.vmem %s1141_s10, 128  ;;  %s971_s15 = smov [#allocation2]  }
  0x54   : > { %p881_p12 = scmp.ne.s32.totalorder %s1141_s10, %s880_s30  ;;  %s885_s16 = sshll.u32 %s971_s15, 4  ;;  %s886_s16 = int_to_ptr.vmem [resolvable:$false] %s885_s16 }
  0x55   : > { %s887_s9 = scalar_lea.vmem %s886_s16, 256  ;;  %p888_p4 = scmp.lt.s32.totalorder %s1141_s10, %s886_s16 }
  0x56   : > { %p883_p2 = pnand %p881_p12, %p867_p0  ;;  %p889_p13 = scmp.lt.s32.totalorder %s887_s9, %s880_s30 }
  0x58   : > { %p884_p5 = pneg %p883_p2  ;;  %p890_p6 = por %p889_p13, %p888_p4 }
  0x5a   : > { %p891_p10 = pnand %p890_p6, %p884_p5 }
  0x5c   : > { %894 = shalt.err (!%p891_p10)
}
  0x5d   : > { %757 = dma.hbm_to_vmem [thread:$0]  (!%p1143_p11), %s1139_s8, 128, %s1141_s10, %s209_s28  }
  0x5e   : > { %228 = sbr.rel (%p1046_p8) target bundleno = 598 (0x256), region = 40  ;;  %s1175_s12 = sand.u32 (!%p1046_p8), 1, %s957_s19  }
  0x5f   : > { %s573_s13 = sshll.u32 (!%p1046_p8), %s1175_s12, 3  ;;  %s231_s29 = scalar_lea.sflag (!%p1046_p8), [#allocation3], %s1175_s12 }
  0x60   : > { %s1181_s17 = scalar_lea.vmem (!%p1046_p8), [#allocation2], %s573_s13  ;;  %p1280_p4 = scmp.ne.s32.totalorder (!%p1046_p8), %s1273_s24, 0 }
  0x65   : > { %940 = dma.done.wait (%p1280_p4), %s231_s29, 128  }
  0x66   : > { %942 = vsyncadd (%p1280_p4), %s231_s29, 4294967168  ;;  %p1281_p5 = scmp.eq.s32.totalorder %s1027_s22, 0 }
  0x68   : > { %944 = dma.done.wait (%p1281_p5), [#allocation6], 4096   ;;  %p1282_p8 = pmov %p1281_p5 }
  0x69   : > { %v972_v0 = vmov 0.0|0.0   ;;  %vm973_vm0 = vmmov 0   ;;  %v974_v1 = vmov 0.0   ;;  %v270_v2 = vld [vmem:[#allocation5] sm:$0xff]  ;;  %v271_v3 = vld [vmem:[#allocation5 + $0x8] sm:$0xff]  ;;  %v272_v4 = vld [vmem:[#allocation5 + $0x10] sm:$0xff] }
  0x6a   : > { %946 = vsyncadd (%p1282_p8), [#allocation6], 4294963200  ;;  %687 = vmatprep.subr.bf16.mxu0 %v972_v0  ;;  %649 = vmatprep.mubr.msk.f32.mxu0 %vm973_vm0, %v974_v1  ;;  %v688_v5 = vpack.c.bf16 %v271_v3, %v270_v2  ;;  %v273_v6 = vld [vmem:[#allocation5 + $0x18] sm:$0xff]  ;;  %v274_v8 = vld [vmem:[#allocation5 + $0x20] sm:$0xff]  ;;  %s580_s11 = sshll.u32 %s1027_s22, 7  ;;  %s268_s28 = scalar_lea.vmem [#allocation8], %s573_s13 }
  0x6b   : > { %711 = vmatprep.subr.bf16.mxu1 %v972_v0  ;;  %684 = vmatprep.mubr.msk.f32.mxu1 %vm973_vm0, %v974_v1  ;;  %v691_v7 = vpack.c.bf16 %v273_v6, %v272_v4  ;;  %v275_v9 = vld [vmem:[#allocation5 + $0x28] sm:$0xff]  ;;  %v368_v10 = vld [vmem:[#allocation7] sm:$0xff]  ;;  %v370_v12 = vld [vmem:[#allocation7 + $0x10] sm:$0xff]  ;;  %s476_s7 = sshll.u32 %s268_s28, 4  ;;  %s1220_s15 = scalar_lea.hbm %s1269_s5, %s580_s11  ;;  %s1222_s7 = int_to_ptr.vmem [resolvable:$true] %s476_s7 }
  0x6c   : > { %689 = vmatpush3.bf16.msra.mxu0 %v688_v5  ;;  %v369_v11 = vld [vmem:[#allocation7 + $0x8] sm:$0xff]  ;;  %v371_v13 = vld [vmem:[#allocation7 + $0x18] sm:$0xff]  ;;  %v694_v14 = vpack.c.bf16 %v275_v9, %v274_v8  ;;  %v276_v16 = vld [vmem:[#allocation5 + $0x30] sm:$0xff]  ;;  %s463_s16 = scalar_lea.sflag [#allocation4], %s1175_s12  ;;  %s895_s9 = scalar_lea.vmem %s1222_s7, 128 }
  0x6d   : > { %690 = vmatprep.subr.bf16.mxu0 %v972_v0  ;;  %v712_v15 = vpack.c.bf16 %v369_v11, %v368_v10  ;;  %v277_v17 = vld [vmem:[#allocation5 + $0x38] sm:$0xff]  ;;  %v715_v18 = vpack.c.bf16 %v371_v13, %v370_v12  ;;  %v372_v19 = vld [vmem:[#allocation7 + $0x20] sm:$0xff]  ;;  %v373_v20 = vld [vmem:[#allocation7 + $0x28] sm:$0xff]  ;;  %p896_p11 = scmp.ne.s32.totalorder %s1222_s7, %s895_s9  ;;  %p1283_p0 = scmp.ne.s32.totalorder %s1278_s23, 0 }
  0x6e   : > { %v697_v21 = vpack.c.bf16 %v277_v17, %v276_v16  ;;  %v278_v22 = vld [vmem:[#allocation5 + $0x40] sm:$0xff]  ;;  %v279_v23 = vld [vmem:[#allocation5 + $0x48] sm:$0xff]  ;;  %v718_v24 = vpack.c.bf16 %v373_v20, %v372_v19  ;;  %v280_v26 = vld [vmem:[#allocation5 + $0x50] sm:$0xff]  ;;  %s975_s22 = smov [#allocation8]  }
  0x6f   : > { %713 = vmatpush3.bf16.msra.mxu1 %v712_v15  ;;  %v700_v25 = vpack.c.bf16 %v279_v23, %v278_v22  ;;  %v281_v27 = vld [vmem:[#allocation5 + $0x58] sm:$0xff]  ;;  %v282_v29 = vld [vmem:[#allocation5 + $0x60] sm:$0xff]  ;;  %v283_v30 = vld [vmem:[#allocation5 + $0x68] sm:$0xff]  ;;  %p897_p1 = pnand %p896_p11, %p1283_p0  ;;  %s899_s13 = sshll.u32 %s975_s22, 4  ;;  %s900_s13 = int_to_ptr.vmem [resolvable:$false] %s899_s13 }
  0x70   : > { %692 = vmatpush3.bf16.msra.mxu0 %v691_v7  ;;  %714 = vmatprep.subr.bf16.mxu1 %v972_v0  ;;  %v703_v28 = vpack.c.bf16 %v281_v27, %v280_v26  ;;  %v706_v31 = vpack.c.bf16 %v283_v30, %v282_v29  ;;  %v284_v32 = vld [vmem:[#allocation5 + $0x70] sm:$0xff]  ;;  %v285_v33 = vld [vmem:[#allocation5 + $0x78] sm:$0xff]  ;;  %v376_v39 = vld [vmem:[#allocation7 + $0x40] sm:$0xff]  ;;  %s901_s29 = scalar_lea.vmem %s900_s13, 256  ;;  %p902_p7 = scmp.lt.s32.totalorder %s1222_s7, %s900_s13 }
  0x71   : > { %693 = vmatprep.subr.bf16.mxu0 %v972_v0  ;;  %v709_v34 = vpack.c.bf16 %v285_v33, %v284_v32  ;;  %v269_v35 = vld [vmem:[%s1181_s17] sm:$0xff]  ;;  %v377_v40 = vld [vmem:[#allocation7 + $0x48] sm:$0xff]  ;;  %v380_v45 = vld [vmem:[#allocation7 + $0x60] sm:$0xff]  ;;  %p898_p3 = pneg %p897_p1  ;;  %p903_p9 = scmp.lt.s32.totalorder %s901_s29, %s895_s9 }
  0x72   : > { %v374_v36 = vld [vmem:[#allocation7 + $0x30] sm:$0xff]  ;;  %v375_v37 = vld [vmem:[#allocation7 + $0x38] sm:$0xff]  ;;  %v724_v41 = vpack.c.bf16 %v377_v40, %v376_v39  ;;  %v381_v46 = vld [vmem:[#allocation7 + $0x68] sm:$0xff] }
  0x73   : > { %716 = vmatpush3.bf16.msra.mxu1 %v715_v18  ;;  %v721_v38 = vpack.c.bf16 %v375_v37, %v374_v36  ;;  %v378_v42 = vld [vmem:[#allocation7 + $0x50] sm:$0xff]  ;;  %v379_v43 = vld [vmem:[#allocation7 + $0x58] sm:$0xff]  ;;  %v730_v47 = vpack.c.bf16 %v381_v46, %v380_v45  ;;  %p904_p12 = por %p903_p9, %p902_p7 }
  0x74   : > { %695 = vmatpush3.bf16.msra.mxu0 %v694_v14  ;;  %717 = vmatprep.subr.bf16.mxu1 %v972_v0  ;;  %v727_v44 = vpack.c.bf16 %v379_v43, %v378_v42  ;;  %v382_v48 = vld [vmem:[#allocation7 + $0x70] sm:$0xff]  ;;  %v383_v49 = vld [vmem:[#allocation7 + $0x78] sm:$0xff] }
  0x75   : > { %696 = vmatprep.subr.bf16.mxu0 %v972_v0  ;;  %v733_v50 = vpack.c.bf16 %v383_v49, %v382_v48  ;;  %v577_v51 = vld [vmem:[%s1266_s2] ss:$0 sm:$0xff]  ;;  %p905_p2 = pnand %p904_p12, %p898_p3 }
  0x76   : > { %v578_v60 = vld [vmem:[%s1268_s4] ss:$0 sm:$0xff] }
  0x77   : > { %719 = vmatpush3.bf16.msra.mxu1 %v718_v24 }
  0x78   : > { %698 = vmatpush3.bf16.msra.mxu0 %v697_v21  ;;  %720 = vmatprep.subr.bf16.mxu1 %v972_v0 }
  0x79   : > { %699 = vmatprep.subr.bf16.mxu0 %v972_v0 }
  0x7b   : > { %722 = vmatpush3.bf16.msra.mxu1 %v721_v38 }
  0x7c   : > { %701 = vmatpush3.bf16.msra.mxu0 %v700_v25  ;;  %723 = vmatprep.subr.bf16.mxu1 %v972_v0 }
  0x7d   : > { %702 = vmatprep.subr.bf16.mxu0 %v972_v0 }
  0x7f   : > { %725 = vmatpush3.bf16.msra.mxu1 %v724_v41 }
  0x80   : > { %704 = vmatpush3.bf16.msra.mxu0 %v703_v28  ;;  %726 = vmatprep.subr.bf16.mxu1 %v972_v0 }
  0x81   : > { %705 = vmatprep.subr.bf16.mxu0 %v972_v0 }
  0x83   : > { %728 = vmatpush3.bf16.msra.mxu1 %v727_v44 }
  0x84   : > { %707 = vmatpush3.bf16.msra.mxu0 %v706_v31  ;;  %729 = vmatprep.subr.bf16.mxu1 %v972_v0 }
  0x85   : > { %708 = vmatprep.subr.bf16.mxu0 %v972_v0 }
  0x87   : > { %731 = vmatpush3.bf16.msra.mxu1 %v730_v47 }
  0x88   : > { %710 = vmatpush3.bf16.msra.mxu0 %v709_v34  ;;  %732 = vmatprep.subr.bf16.mxu1 %v972_v0 }
  0x8b   : > { %650 = vmatmul.mubr.f32.vlgmr.msra.gmra.mrb[0].mxu0 %v269_v35  ;;  %734 = vmatpush3.bf16.msra.mxu1 %v733_v50 }
 0x15e   : > { %v359_v52 = vpop.f32.mrb[0].mxu0 }
 0x15f   : > { %v360_v53 = vadd.f32 %v577_v51, %v359_v52  ;;  %v651_v54 = vpop.f32.mrb[1].mxu0 }
 0x161   : > { %v364_v55 = vmul.f32 0.70710677, %v360_v53  ;;  %v363_v57 = vmul.f32 0.5, %v360_v53 }
 0x163   : > { %807 = verf.f32 %v364_v55 }
 0x16d   : > { %v808_v56 = vpop.eup %807 }
 0x16e   : > { %v366_v58 = vadd.f32 1.0, %v808_v56 }
 0x170   : > { %v367_v59 = vmul.f32 %v366_v58, %v363_v57 }
 0x172   : > { %685 = vmatmul.mubr.f32.vlgmr.msra.gmra.mrb[0].mxu1 %v367_v59 }
 0x245   : > { %v457_v61 = vpop.f32.mrb[0].mxu1 }
 0x246   : > { %v458_v62 = vadd.f32 %v578_v60, %v457_v61  ;;  %v686_v63 = vpop.f32.mrb[1].mxu1 }
 0x248   : > { %461 = vst [vmem:[%s268_s28] sm:$0xff] %v458_v62 }
 0x249   : > { %908 = shalt.err (!%p905_p2)
}
 0x24a   : > { %s909_s12 = scalar_lea.hbm %s1220_s15, 128  ;;  %s913_s26 = scalar_lea.hbm %s1269_s5, 256 }
 0x24b   : > { %p910_p13 = scmp.ne.s32.totalorder %s1220_s15, %s909_s12  ;;  %p914_p4 = scmp.lt.u32.totalorder %s1220_s15, %s1269_s5 }
 0x24c   : > { %p915_p5 = scmp.lt.u32.totalorder %s913_s26, %s909_s12  ;;  %p917_p11 = scmp.lt.u32.totalorder %s909_s12, %s1220_s15 }
 0x24d   : > { %p911_p6 = pnand %p910_p13, %p1283_p0 }
 0x24e   : > { %p916_p8 = por %p915_p5, %p914_p4 }
 0x24f   : > { %p912_p10 = pneg %p911_p6 }
 0x250   : > { %p918_p1 = por %p917_p11, %p916_p8 }
 0x252   : > { %p919_p3 = pnand %p918_p1, %p912_p10 }
 0x254   : > { %922 = shalt.err (!%p919_p3)
}
 0x255   : > { %745 = dma.vmem_to_hbm [thread:$0]  (%p1283_p0), %s1222_s7, 128, %s1220_s15, %s463_s16  }
 0x256 PF: > { %s488_s11 = sand.u32 1, %s953_s18   ;;  %p1284_p7 = scmp.ne.s32.totalorder %s1274_s25, 0 }
 0x257   : > { %p1285_p9 = scmp.ge.s32.totalorder %s965_s21, 2  ;;  %s489_s28 = scalar_lea.sflag [#allocation4], %s488_s11 }
 0x259   : > { %p759_p12 = pnand %p1285_p9, %p1284_p7 }
 0x25b   : > { %948 = dma.done.wait (!%p759_p12), %s489_s28, 128  }
 0x25c   : > { %950 = vsyncadd (!%p759_p12), %s489_s28, 4294967168  ;;  %p19_p2 = scmp.ge.s32.totalorder %s1116_s14, 4   ;;  %s1286_s18 = smov %s957_s19 }
 0x25d   : > { %s1287_s19 = smov %s961_s20  ;;  %s1288_s20 = smov %s1132_s27 }
 0x25e   : > { %s1289_s21 = smov %s1116_s14  ;;  %21 = sbr.rel (!%p19_p2) target bundleno = 6 (0x6), region = 93 }
 0x265   :  { %494 = vsyncpa [#allocation3], 1 }
 0x266   :  { %496 = vsyncpa [#allocation3 + $0x1], 1 }
 0x267   :  { %497 = vsyncpa [#allocation6], 1 }
 0x268   :  { %498 = vsyncpa [#allocation4], 1 }
 0x269   :  { %500 = vsyncpa [#allocation4 + $0x1], 1 }

</bundles_post_ra>
